<compile_context>
chip_gen: v7x
topology: tpu7x:2x2x1
jax: 0.10.0
libtpu: 0.0.40
codegen_flags: <defaults>
</compile_context>

<pallas_src>
import functools
import math

import jax
import jax.numpy as jnp
from jax import lax
from jax.experimental import pallas as pl
from jax.experimental.pallas import tpu as pltpu


# ---------------------------------------------------------------------------
# Kernel 1: fused QKV projection  (x @ [Wq*scale | Wk | Wv]^T)
# ---------------------------------------------------------------------------
def _qkv_proj_kernel(x_ref, w_ref, q_ref, k_ref, v_ref, *, head_size):
    qkv = jnp.dot(x_ref[...], w_ref[...],
                  preferred_element_type=jnp.float32)           # (blk, 3H)
    q_ref[...] = qkv[:, :head_size].astype(q_ref.dtype)
    k_ref[...] = qkv[:, head_size:2 * head_size].astype(k_ref.dtype)
    v_ref[...] = qkv[:, 2 * head_size:].astype(v_ref.dtype)


# ---------------------------------------------------------------------------
# Kernel 2: flash attention (non-causal, single head, q pre-scaled)
# ---------------------------------------------------------------------------
def _flash_attn_kernel(q_ref, k_ref, v_ref, o_ref, m_scr, l_scr, acc_scr,
                       *, block_k, seq_len, needs_mask):
    ki = pl.program_id(2)

    @pl.when(ki == 0)
    def _init():
        m_scr[...] = jnp.full(m_scr.shape, -jnp.inf, dtype=m_scr.dtype)
        l_scr[...] = jnp.zeros(l_scr.shape, dtype=l_scr.dtype)
        acc_scr[...] = jnp.zeros(acc_scr.shape, dtype=acc_scr.dtype)

    q = q_ref[...]                                              # (tq, H)
    k = k_ref[...]                                              # (tk, H)
    v = v_ref[...]                                              # (tk, H)

    # scores: q @ k^T with the transpose folded into the MXU contraction.
    s = lax.dot_general(q, k,
                        dimension_numbers=(((1,), (1,)), ((), ())),
                        preferred_element_type=jnp.float32)     # (tq, tk)

    if needs_mask:
        # Only present when the sequence was padded to a tile multiple.
        col = ki * block_k + lax.broadcasted_iota(jnp.int32, s.shape, 1)
        s = jnp.where(col < seq_len, s, -jnp.inf)

    # online softmax update (numerically stable)
    m_prev = m_scr[...]
    m_new = jnp.maximum(m_prev, jnp.max(s, axis=-1, keepdims=True))
    alpha = jnp.exp(m_prev - m_new)
    p = jnp.exp(s - m_new)
    l_scr[...] = alpha * l_scr[...] + jnp.sum(p, axis=-1, keepdims=True)
    acc_scr[...] = alpha * acc_scr[...] + jnp.dot(
        p.astype(v.dtype), v, preferred_element_type=jnp.float32)
    m_scr[...] = m_new

    # TODO(synk): training-mode dropout on the attention weights (stateful
    # pltpu.prng_seed / prng_random_bits mask) not implemented; eval == identity.

    @pl.when(ki == pl.num_programs(2) - 1)
    def _finalize():
        # Exact division: runs once per query tile, negligible cost, avoids
        # the ~1e-3 error of the approx EUP reciprocal.
        o_ref[...] = (acc_scr[...] / l_scr[...]).astype(o_ref.dtype)


# ---------------------------------------------------------------------------
# Host-side helpers
# ---------------------------------------------------------------------------
def _sublane_multiple(dtype):
    return 16 if dtype == jnp.bfloat16 else 8


def _pick_block(T, dtype, target=512, fallback=256):
    """Return (block, padded_T). Block is either T itself (full-dim tile),
    a sublane-aligned divisor of T, or `fallback` with padding + masking."""
    mult = _sublane_multiple(dtype)
    if T <= target:
        return T, T                      # full-extent block is always legal
    for t in range(target, mult - 1, -mult):
        if T % t == 0:
            return t, T
    padded = pl.cdiv(T, fallback) * fallback
    return fallback, padded


def _vmem_limit_bytes():
    # Leave headroom for Mosaic internal scratch / double-buffered tiles;
    # never claim the entire physical VMEM (64 MiB on v7x).
    try:
        cap = getattr(pltpu.get_tpu_info(), "vmem_capacity_bytes", None)
    except Exception:
        cap = None
    if not cap:
        return 48 * 1024 * 1024
    return int(min((cap * 3) // 4, 96 * 1024 * 1024))


def _compiler_params(dim_semantics):
    return pltpu.CompilerParams(
        dimension_semantics=dim_semantics,
        vmem_limit_bytes=_vmem_limit_bytes(),
    )


def head_forward(x, w_key, w_query, w_value, *, block=None):
    """x: (B, T, C); w_*: (head_size, n_embd) PyTorch-style Linear weights."""
    B, T, C = x.shape
    H = w_key.shape[0]
    orig_T = T
    scale = C ** (-0.5)   # matches the module: scaled by n_embd, not head_size
    dtype = x.dtype

    if block is None:
        blk, T_pad = _pick_block(T, dtype)
    else:
        blk, T_pad = block, pl.cdiv(T, block) * block
    needs_mask = T_pad != T
    if needs_mask:
        x = jnp.pad(x, ((0, 0), (0, T_pad - T), (0, 0)))
    n_blocks = T_pad // blk

    # Fused projection weight (C, 3H); the attention scale is folded into the
    # Q columns so the kernel never multiplies the score matrix by it.
    w_qkv = jnp.concatenate(
        [w_query.T * scale, w_key.T, w_value.T], axis=1).astype(dtype)

    # --- Kernel 1: q, k, v = x @ w_qkv (projected once, not once per q-tile)
    q, k, v = pl.pallas_call(
        functools.partial(_qkv_proj_kernel, head_size=H),
        out_shape=tuple(jax.ShapeDtypeStruct((B, T_pad, H), dtype)
                        for _ in range(3)),
        grid_spec=pltpu.PrefetchScalarGridSpec(
            num_scalar_prefetch=0,
            grid=(B, n_blocks),
            in_specs=[
                pl.BlockSpec((None, blk, C), lambda b, i: (b, i, 0)),
                pl.BlockSpec((C, 3 * H), lambda b, i: (0, 0)),
            ],
            out_specs=(
                pl.BlockSpec((None, blk, H), lambda b, i: (b, i, 0)),
                pl.BlockSpec((None, blk, H), lambda b, i: (b, i, 0)),
                pl.BlockSpec((None, blk, H), lambda b, i: (b, i, 0)),
            ),
        ),
        compiler_params=_compiler_params(("parallel", "parallel")),
    )(x, w_qkv)

    # --- Kernel 2: flash attention over (tk, H) k/v streams
    out = pl.pallas_call(
        functools.partial(_flash_attn_kernel, block_k=blk, seq_len=orig_T,
                          needs_mask=needs_mask),
        out_shape=jax.ShapeDtypeStruct((B, T_pad, H), dtype),
        grid_spec=pltpu.PrefetchScalarGridSpec(
            num_scalar_prefetch=0,
            grid=(B, n_blocks, n_blocks),
            in_specs=[
                pl.BlockSpec((None, blk, H), lambda b, qi, ki: (b, qi, 0)),
                pl.BlockSpec((None, blk, H), lambda b, qi, ki: (b, ki, 0)),
                pl.BlockSpec((None, blk, H), lambda b, qi, ki: (b, ki, 0)),
            ],
            out_specs=pl.BlockSpec((None, blk, H), lambda b, qi, ki: (b, qi, 0)),
            scratch_shapes=[
                pltpu.VMEM((blk, 1), jnp.float32),   # running max m
                pltpu.VMEM((blk, 1), jnp.float32),   # running denom l
                pltpu.VMEM((blk, H), jnp.float32),   # output accumulator
            ],
        ),
        compiler_params=_compiler_params(("parallel", "parallel", "arbitrary")),
    )(q, k, v)

    if needs_mask:
        out = out[:, :orig_T, :]
    return out


def head_reference(x, w_key, w_query, w_value):
    """Pure-JAX reference mirroring the PyTorch forward (eval mode)."""
    B, T, C = x.shape
    k = x @ w_key.T
    q = x @ w_query.T
    v = x @ w_value.T
    wei = (q @ jnp.swapaxes(k, -2, -1)) * C ** (-0.5)
    wei = jax.nn.softmax(wei, axis=-1)
    return wei @ v


if __name__ == "__main__":
    # Small shapes consistent with the module: batch=2, seq=8, n_embd=32, head_size=16
    B, T, C, H = 2, 8, 32, 16
    dropout = 0.1  # unused in eval mode

    key = jax.random.PRNGKey(0)
    kx, kk, kq, kv = jax.random.split(key, 4)

    x = jax.random.normal(kx, (B, T, C), dtype=jnp.float32)
    # Deterministic synthetic Linear weights, PyTorch shape (head_size, n_embd)
    bound = 1.0 / math.sqrt(C)
    w_key_p   = jax.random.uniform(kk, (H, C), jnp.float32, -bound, bound)
    w_query_p = jax.random.uniform(kq, (H, C), jnp.float32, -bound, bound)
    w_value_p = jax.random.uniform(kv, (H, C), jnp.float32, -bound, bound)

    out = head_forward(x, w_key_p, w_query_p, w_value_p)
    out = jax.block_until_ready(out)

    ref = head_reference(x, w_key_p, w_query_p, w_value_p)
    assert out.shape == (B, T, H)
    assert jnp.allclose(out, ref, atol=2e-3, rtol=2e-3), "mismatch vs reference"

    print("KERNEL_OK")
</pallas_src>

<mosaic_0001>
module attributes {stable_mosaic.version = 11 : i64} {
  func.func @_qkv_proj_kernel(%arg0: i32, %arg1: i32, %arg2: memref<1x8x32xf32, #tpu.memory_space<vmem>>, %arg3: memref<32x48xf32, #tpu.memory_space<vmem>>, %arg4: memref<1x8x16xf32, #tpu.memory_space<vmem>>, %arg5: memref<1x8x16xf32, #tpu.memory_space<vmem>>, %arg6: memref<1x8x16xf32, #tpu.memory_space<vmem>>) attributes {dimension_semantics = [#tpu.dimension_semantics<parallel>, #tpu.dimension_semantics<parallel>], iteration_bounds = array<i64: 2, 1>, scalar_prefetch = 0 : i64, scratch_operands = 0 : i64, tpu.core_type = #tpu.core_type<tc>, window_params = [{transform_indices = @transform_0, window_bounds = array<i64: 1, 8, 32>}, {pipeline_mode = #tpu.pipeline_mode<synchronous>, transform_indices = @transform_1, window_bounds = array<i64: 32, 48>}, {transform_indices = @transform_2, window_bounds = array<i64: 1, 8, 16>}, {transform_indices = @transform_3, window_bounds = array<i64: 1, 8, 16>}, {transform_indices = @transform_4, window_bounds = array<i64: 1, 8, 16>}]} {
    %c0 = arith.constant 0 : index
    %c0_0 = arith.constant 0 : index
    %c0_1 = arith.constant 0 : index
    %0 = vector.load %arg2[%c0, %c0_0, %c0_1] : memref<1x8x32xf32, #tpu.memory_space<vmem>>, vector<1x8x32xf32>
    %1 = vector.shape_cast %0 : vector<1x8x32xf32> to vector<8x32xf32>
    %c0_2 = arith.constant 0 : index
    %c0_3 = arith.constant 0 : index
    %2 = vector.load %arg3[%c0_2, %c0_3] : memref<32x48xf32, #tpu.memory_space<vmem>>, vector<32x48xf32>
    %cst = arith.constant dense<0.000000e+00> : vector<8x48xf32>
    %3 = tpu.matmul %1, %2, %cst {dimension_numbers = #tpu.dot_dimension_numbers<[1], [0], [0], [1], [0, 0, 1, 1], [], []>} : vector<8x32xf32>, vector<32x48xf32>, vector<8x48xf32> -> vector<8x48xf32>
    %4 = vector.extract_strided_slice %3 {offsets = [0, 0], sizes = [8, 16], strides = [1, 1]} : vector<8x48xf32> to vector<8x16xf32>
    %c0_4 = arith.constant 0 : index
    %c0_5 = arith.constant 0 : index
    %c0_6 = arith.constant 0 : index
    %5 = vector.load %arg4[%c0_4, %c0_5, %c0_6] : memref<1x8x16xf32, #tpu.memory_space<vmem>>, vector<1x8x16xf32>
    %6 = vector.shape_cast %5 : vector<1x8x16xf32> to vector<8x16xf32>
    %7 = vector.shape_cast %4 : vector<8x16xf32> to vector<1x8x16xf32>
    tpu.vector_store %arg4[%c0_4, %c0_5, %c0_6], %7 {strides = array<i32>} : memref<1x8x16xf32, #tpu.memory_space<vmem>>, vector<1x8x16xf32>,
    %8 = vector.extract_strided_slice %3 {offsets = [0, 16], sizes = [8, 16], strides = [1, 1]} : vector<8x48xf32> to vector<8x16xf32>
    %c0_7 = arith.constant 0 : index
    %c0_8 = arith.constant 0 : index
    %c0_9 = arith.constant 0 : index
    %9 = vector.load %arg5[%c0_7, %c0_8, %c0_9] : memref<1x8x16xf32, #tpu.memory_space<vmem>>, vector<1x8x16xf32>
    %10 = vector.shape_cast %9 : vector<1x8x16xf32> to vector<8x16xf32>
    %11 = vector.shape_cast %8 : vector<8x16xf32> to vector<1x8x16xf32>
    tpu.vector_store %arg5[%c0_7, %c0_8, %c0_9], %11 {strides = array<i32>} : memref<1x8x16xf32, #tpu.memory_space<vmem>>, vector<1x8x16xf32>,
    %12 = vector.extract_strided_slice %3 {offsets = [0, 32], sizes = [8, 16], strides = [1, 1]} : vector<8x48xf32> to vector<8x16xf32>
    %c0_10 = arith.constant 0 : index
    %c0_11 = arith.constant 0 : index
    %c0_12 = arith.constant 0 : index
    %13 = vector.load %arg6[%c0_10, %c0_11, %c0_12] : memref<1x8x16xf32, #tpu.memory_space<vmem>>, vector<1x8x16xf32>
    %14 = vector.shape_cast %13 : vector<1x8x16xf32> to vector<8x16xf32>
    %15 = vector.shape_cast %12 : vector<8x16xf32> to vector<1x8x16xf32>
    tpu.vector_store %arg6[%c0_10, %c0_11, %c0_12], %15 {strides = array<i32>} : memref<1x8x16xf32, #tpu.memory_space<vmem>>, vector<1x8x16xf32>,
    return
  }
  func.func @transform_0(%arg0: i32, %arg1: i32) -> (i32, i32, i32) {
    %c0_i32 = arith.constant 0 : i32
    %c0_i32_0 = arith.constant 0 : i32
    return %arg0, %arg1, %c0_i32 : i32, i32, i32
  }
  func.func @transform_1(%arg0: i32, %arg1: i32) -> (i32, i32) {
    %c0_i32 = arith.constant 0 : i32
    %c0_i32_0 = arith.constant 0 : i32
    %c0_i32_1 = arith.constant 0 : i32
    return %c0_i32, %c0_i32_0 : i32, i32
  }
  func.func @transform_2(%arg0: i32, %arg1: i32) -> (i32, i32, i32) {
    %c0_i32 = arith.constant 0 : i32
    %c0_i32_0 = arith.constant 0 : i32
    return %arg0, %arg1, %c0_i32 : i32, i32, i32
  }
  func.func @transform_3(%arg0: i32, %arg1: i32) -> (i32, i32, i32) {
    %c0_i32 = arith.constant 0 : i32
    %c0_i32_0 = arith.constant 0 : i32
    return %arg0, %arg1, %c0_i32 : i32, i32, i32
  }
  func.func @transform_4(%arg0: i32, %arg1: i32) -> (i32, i32, i32) {
    %c0_i32 = arith.constant 0 : i32
    %c0_i32_0 = arith.constant 0 : i32
    return %arg0, %arg1, %c0_i32 : i32, i32, i32
  }
}

</mosaic_0001>

<bundles_post_ra>
// kernel: tpu_custom_call.1
= control target key start
LH: loop header
LB: loop body
LE: loop exit
PB: predicated region body
PF: predicated region fallthrough
CT: control target
= control target key end

     0   :  { %10 = vsyncpa [#allocation3], 0  ;;  %s1236_s0 = inlined_call_operand.hbm [shape: f32[2,8,32], index: 0, kind: input, shape index: {}]   ;;  %s1237_s1 = inlined_call_operand.hbm [shape: f32[32,48], index: 1, kind: input, shape index: {}]   ;;  %s1238_s2 = inlined_call_operand.hbm [shape: f32[2,8,16], index: 2, kind: output, shape index: {0}]   ;;  %s1239_s3 = inlined_call_operand.hbm [shape: f32[2,8,16], index: 3, kind: output, shape index: {1}]   ;;  %s1240_s4 = inlined_call_operand.hbm [shape: f32[2,8,16], index: 4, kind: output, shape index: {2}]  }
   0x1   :  { %12 = vsyncpa [#allocation3 + $0x1], 0 }
   0x2   :  { %13 = vsyncpa [#allocation6], 0 }
   0x3   :  { %14 = vsyncpa [#allocation4], 0 }
   0x4   :  { %16 = vsyncpa [#allocation4 + $0x1], 0 }
   0x5   :  { %17 = vsyncpa [#allocation9], 0 }
   0x6   :  { %19 = vsyncpa [#allocation9 + $0x1], 0  ;;  %s940_s15 = smov 0   ;;  %s942_s16 = smov 0  }
   0x7   :  { %s944_s17 = smov 0   ;;  %s946_s18 = smov 0  }
   0x8   :  { %s948_s19 = smov 0   ;;  %s950_s20 = smov 0  }
   0x9 LB: > { %s971_s21 = sadd.s32 4294967295, %s901_s20   ;;  %s564_s22 = sadd.s32 4294967294, %s901_s20   ;;  %s901_s20 = sphi %s950_s20, %s25_s20   ;;  %s897_s19 = sphi %s948_s19, %s1262_s19   ;;  %s893_s18 = sphi %s946_s18, %s1261_s18   ;;  %s889_s17 = sphi %s944_s17, %s1260_s17   ;;  %s885_s16 = sphi %s942_s16, %s1259_s16   ;;  %s881_s15 = sphi %s940_s15, %s1258_s15  }
   0xa   : > { %p59_p0 = scmp.ne.s32.totalorder %s885_s16, %s881_s15  ;;  %p1241_p1 = scmp.eq.s32.totalorder %s971_s21, 0 }
   0xb   : > { %p112_p3 = scmp.eq.s32.totalorder %s564_s22, 1  ;;  %p565_p5 = scmp.ge.s32.totalorder %s901_s20, 1 }
   0xc   : > { %p982_p4 = por %p1241_p1, %p59_p0  ;;  %p175_p7 = scmp.lt.s32.totalorder %s901_s20, 3 }
   0xd   : > { %p987_p6 = por %p112_p3, %p59_p0  ;;  %s903_s26 = smov [#allocation5]  }
   0xe   : > { %s1244_s23 = scalar_select %p982_p4, 1, 0 }
   0xf   : > { %s1245_s24 = scalar_select %p987_p6, 1, 0 }
  0x10   : > { %p992_p8 = pnand %p565_p5, %p175_p7  ;;  %s187_s27 = sshll.u32 %s903_s26, 4  ;;  %s188_s27 = int_to_ptr.vmem [resolvable:$true] %s187_s27 }
  0x11   : > { %s37_s29 = sadd.s32 1, %s897_s19  ;;  %s697_s6 = scalar_lea.hbm %s1237_s1, 512 }
  0x12   : > { %s1246_s25 = scalar_select %p992_p8, 1, 0 }
  0x13   : > { %p619_p9 = pneg %p992_p8  ;;  %p698_p12 = scmp.ne.s32.totalorder %s1237_s1, %s697_s6 }
  0x14   : > { %p704_p5 = scmp.lt.u32.totalorder %s697_s6, %s1237_s1 }
  0x15   : > { %p1001_p11 = pnand %p619_p9, %p1241_p1 }
  0x17   : > { %p699_p13 = pneg %p1001_p11 }
  0x19   : > { %p700_p0 = pnand %p699_p13, %p698_p12 }
  0x1b   : > { %p701_p3 = pneg %p700_p0 }
  0x1d   : > { %p706_p7 = pnand %p704_p5, %p701_p3 }
  0x1f   : > { %709 = shalt.err (!%p706_p7)
}
  0x20   : > { %s710_s11 = scalar_lea.vmem %s188_s27, 512  ;;  %p718_p2 = scmp.lt.s32.totalorder %s188_s27, %s188_s27 }
  0x21   : > { %p711_p9 = scmp.ne.s32.totalorder %s188_s27, %s710_s11  ;;  %p719_p6 = scmp.lt.s32.totalorder %s710_s11, %s710_s11 }
  0x23   : > { %p713_p10 = pnand %p711_p9, %p699_p13  ;;  %p720_p4 = por %p719_p6, %p718_p2 }
  0x25   : > { %p714_p1 = pneg %p713_p10 }
  0x27   : > { %p721_p8 = pnand %p720_p4, %p714_p1 }
  0x29   : > { %724 = shalt.err (!%p721_p8)
}
  0x2a   : > { %s904_s12 = smov 128   ;;  %s905_s13 = smov 8  }
  0x2b   : > { %622 = dma.hbm_to_vmem [thread:$0]  (!%p1001_p11), %s1237_s1, 512, %s188_s27, [#allocation6], %s904_s12, %s904_s12, %s905_s13  }
  0x2c   : > { %p39_p1 = scmp.ge.s32.totalorder %s37_s29, 2  ;;  %s46_s30 = sadd.s32 1, %s889_s17 }
  0x2d   : > { %p53_p2 = scmp.ne.s32.totalorder %s889_s17, %s885_s16  ;;  %p54_p4 = scmp.eq.s32.totalorder %s901_s20, 0 }
  0x2e   : > { %s1264_s29 = smov (%p39_p1, %s37_s29), 0  ;;  %p1249_p8 = scmp.eq.s32.totalorder %s971_s21, 1 }
  0x2f   : > { %p1028_p6 = por %p54_p4, %p53_p2  ;;  %s41_s28 = ssub.s32 %s897_s19, %s1264_s29 }
  0x30   : > { %p1034_p10 = por %p1249_p8, %p53_p2  ;;  %p638_p12 = scmp.lt.s32.totalorder %s901_s20, 2 }
  0x31   : > { %p44_p11 = scmp.eq.s32.totalorder %s41_s28, 0  ;;  %s201_s27 = sand.u32 1, %s889_s17  }
  0x32   : > { %s568_s7 = sshll.u32 %s201_s27, 3  ;;  %s569_s9 = sshll.u32 %s897_s19, 7 }
  0x33   : > { %s1043_s8 = scalar_select %p44_p11, %s889_s17, %s46_s30  }
  0x34   : > { %s1049_s12 = scalar_lea.hbm %s1236_s0, %s569_s9  ;;  %s205_s13 = scalar_lea.vmem [#allocation2], %s568_s7 }
  0x35   : > { %s213_s14 = sshll.u32 %s205_s13, 4  ;;  %p1055_p13 = pnand %p638_p12, %p1028_p6  ;;  %s1051_s14 = int_to_ptr.vmem [resolvable:$true] %s213_s14 }
  0x36   : > { %s202_s30 = scalar_lea.sflag [#allocation3], %s201_s27  ;;  %s725_s28 = scalar_lea.hbm %s1049_s12, 128 }
  0x37   : > { %p726_p0 = scmp.ne.s32.totalorder %s1049_s12, %s725_s28  ;;  %p727_p3 = pneg %p1055_p13 }
  0x38   : > { %s730_s10 = scalar_lea.hbm %s1236_s0, 256  ;;  %p731_p9 = scmp.lt.u32.totalorder %s1049_s12, %s1236_s0 }
  0x39   : > { %p728_p5 = pnand %p727_p3, %p726_p0  ;;  %p732_p1 = scmp.lt.u32.totalorder %s730_s10, %s725_s28 }
  0x3a   : > { %p734_p4 = scmp.lt.u32.totalorder %s725_s28, %s1049_s12 }
  0x3b   : > { %p729_p7 = pneg %p728_p5  ;;  %p733_p2 = por %p732_p1, %p731_p9 }
  0x3d   : > { %p735_p6 = por %p734_p4, %p733_p2 }
  0x3f   : > { %p736_p8 = pnand %p735_p6, %p729_p7 }
  0x41   : > { %739 = shalt.err (!%p736_p8)
}
  0x42   : > { %s740_s27 = scalar_lea.vmem %s1051_s14, 128  ;;  %s906_s13 = smov [#allocation2]  }
  0x43   : > { %p741_p12 = scmp.ne.s32.totalorder %s1051_s14, %s740_s27  ;;  %s745_s7 = sshll.u32 %s906_s13, 4  ;;  %s746_s7 = int_to_ptr.vmem [resolvable:$false] %s745_s7 }
  0x44   : > { %s747_s9 = scalar_lea.vmem %s746_s7, 256  ;;  %p748_p5 = scmp.lt.s32.totalorder %s1051_s14, %s746_s7 }
  0x45   : > { %p743_p11 = pnand %p741_p12, %p727_p3  ;;  %p749_p9 = scmp.lt.s32.totalorder %s747_s9, %s740_s27 }
  0x47   : > { %p744_p0 = pneg %p743_p11  ;;  %p750_p1 = por %p749_p9, %p748_p5 }
  0x49   : > { %p751_p2 = pnand %p750_p1, %p744_p0 }
  0x4b   : > { %754 = shalt.err (!%p751_p2)
}
  0x4c   : > { %626 = dma.hbm_to_vmem [thread:$0]  (!%p1055_p13), %s1049_s12, 128, %s1051_s14, %s202_s30  }
  0x4d   : > { %p1252_p7 = scmp.ne.s32.totalorder %s1246_s25, 0 }
  0x4e   : > { %s1087_s28 = sand.u32 (!%p1252_p7), 1, %s885_s16   ;;  %p1253_p3 = scmp.ne.s32.totalorder (!%p1252_p7), %s1244_s23, 0 }
  0x4f   : > { %222 = sbr.rel (%p1252_p7) target bundleno = 464 (0x1d0), region = 28  ;;  %s1090_s10 = sshll.u32 (!%p1252_p7), %s1087_s28, 3 }
  0x50   : > { %s225_s5 = scalar_lea.sflag (!%p1252_p7), [#allocation3], %s1087_s28  ;;  %s228_s11 = scalar_lea.vmem (!%p1252_p7), [#allocation2], %s1090_s10 }
  0x56   : > { %864 = dma.done.wait (%p1253_p3), %s225_s5, 128  }
  0x57   : > { %866 = vsyncadd (%p1253_p3), %s225_s5, 4294967168  ;;  %p1254_p13 = scmp.eq.s32.totalorder %s971_s21, 0 }
  0x59   : > { %868 = dma.done.wait (%p1254_p13), [#allocation6], 512   ;;  %p1255_p4 = pmov %p1254_p13 }
  0x5a   : > { %v907_v0 = vmov 0.0|0.0   ;;  %vm908_vm0 = vmmov 0   ;;  %v909_v1 = vmov 0.0   ;;  %v268_v2 = vld [vmem:[#allocation5] sm:$0xff]  ;;  %v269_v3 = vld [vmem:[#allocation5 + $0x8] sm:$0xff]  ;;  %v270_v4 = vld [vmem:[#allocation5 + $0x10] sm:$0xff] }
  0x5b   : > { %870 = vsyncadd (%p1255_p4), [#allocation6], 4294966784  ;;  %601 = vmatprep.subr.bf16.mxu0 %v907_v0  ;;  %598 = vmatprep.mubr.msk.f32.mxu0 %vm908_vm0, %v909_v1  ;;  %v602_v5 = vpack.c.bf16 %v269_v3, %v268_v2  ;;  %v271_v6 = vld [vmem:[#allocation5 + $0x18] sm:$0xff]  ;;  %vm272_vm1 = vcmask 261120   ;;  %s1103_s23 = sshll.u32 %s893_s18, 7  ;;  %s252_s25 = scalar_lea.vmem [#allocation7], %s1090_s10 }
  0x5c   : > { %v605_v7 = vpack.c.bf16 %v271_v6, %v270_v4  ;;  %v267_v8 = vld [vmem:[%s228_s11] sm:$0xff]  ;;  %s382_s12 = sshll.u32 %s252_s25, 4  ;;  %vm346_vm2 = vcmask 130048   ;;  %s1110_s30 = scalar_lea.hbm %s1238_s2, %s1103_s23  ;;  %s1112_s12 = int_to_ptr.vmem [resolvable:$true] %s382_s12 }
  0x5d   : > { %603 = vmatpush3.bf16.msra.mxu0 %v602_v5  ;;  %s910_s27 = smov 112   ;;  %s358_s18 = scalar_lea.sflag [#allocation4], %s1087_s28 }
  0x5e   : > { %604 = vmatprep.subr.bf16.mxu0 %v907_v0  ;;  %s755_s13 = scalar_lea.vmem %s1112_s12, 128  ;;  %s911_s7 = smov [#allocation7]  }
  0x5f   : > { %p756_p6 = scmp.ne.s32.totalorder %s1112_s12, %s755_s13  ;;  %s759_s9 = sshll.u32 %s911_s7, 4  ;;  %s760_s9 = int_to_ptr.vmem [resolvable:$false] %s759_s9 }
  0x60   : > { %s761_s5 = scalar_lea.vmem %s760_s9, 256  ;;  %p762_p11 = scmp.lt.s32.totalorder %s1112_s12, %s760_s9 }
  0x61   : > { %606 = vmatpush3.bf16.msra.mxu0 %v605_v7  ;;  %p757_p8 = pnand %p756_p6, %p1034_p10  ;;  %p763_p0 = scmp.lt.s32.totalorder %s761_s5, %s755_s13 }
  0x63   : > { %p758_p12 = pneg %p757_p8  ;;  %p764_p5 = por %p763_p0, %p762_p11 }
  0x64   : > { %599 = vmatmul.mubr.msk.f32.vlgmr.msra.gmra.mrb[0].mxu0 %vm272_vm1, %v267_v8 }
  0x65   : > { %p765_p9 = pnand %p764_p5, %p758_p12 }
 0x137   : > { %v342_v9 = vpop.f32.mrb[0].mxu0 }
 0x138   : > { %347 = vst.msk [vmem:[%s252_s25] sm:$0xff] %vm346_vm2, %v342_v9  ;;  %349 = vrot.lane.b32.xlu0 %v342_v9, %s910_s27  ;;  %v600_v10 = vpop.f32.mrb[1].mxu0 }
 0x139   : > { %768 = shalt.err (!%p765_p9)
}
 0x13a   : > { %s769_s28 = scalar_lea.hbm %s1110_s30, 128  ;;  %s773_s14 = scalar_lea.hbm %s1238_s2, 256 }
 0x13b   : > { %p770_p1 = scmp.ne.s32.totalorder %s1110_s30, %s769_s28  ;;  %p774_p3 = scmp.lt.u32.totalorder %s1110_s30, %s1238_s2 }
 0x13c   : > { %p775_p13 = scmp.lt.u32.totalorder %s773_s14, %s769_s28  ;;  %p777_p6 = scmp.lt.u32.totalorder %s769_s28, %s1110_s30 }
 0x13d   : > { %p771_p2 = pnand %p770_p1, %p1034_p10 }
 0x13e   : > { %p776_p4 = por %p775_p13, %p774_p3 }
 0x13f   : > { %p772_p7 = pneg %p771_p2 }
 0x140   : > { %p778_p8 = por %p777_p6, %p776_p4 }
 0x142   : > { %p779_p12 = pnand %p778_p8, %p772_p7 }
 0x144   : > { %782 = shalt.err (!%p779_p12)
}
 0x145   : > { %613 = dma.vmem_to_hbm [thread:$0]  (%p1034_p10), %s1112_s12, 128, %s1110_s30, %s358_s18  }
 0x146   : > { %s912_s13 = smov 96   ;;  %s362_s7 = sand.u32 1, %s971_s21  }
 0x147   : > { %353 = vrot.lane.b32.xlu0 %v342_v9, %s912_s13  ;;  %s259_s9 = scalar_lea.vmem [#allocation8], %s1090_s10  ;;  %s1143_s25 = scalar_lea.hbm %s1239_s3, %s1103_s23 }
 0x148   : > { %s396_s5 = sshll.u32 %s259_s9, 4  ;;  %s266_s14 = scalar_lea.vmem [#allocation10], %s1090_s10  ;;  %s1145_s5 = int_to_ptr.vmem [resolvable:$true] %s396_s5 }
 0x149   : > { %s1150_s26 = sshll.u32 %s266_s14, 4  ;;  %s1153_s21 = scalar_lea.sflag [#allocation9], %s362_s7  ;;  %s1184_s26 = int_to_ptr.vmem [resolvable:$true] %s1150_s26 }
 0x14a   : > { %s783_s12 = scalar_lea.vmem %s1145_s5, 128  ;;  %s913_s30 = smov [#allocation8]  }
 0x14b   : > { %p784_p11 = scmp.ne.s32.totalorder %s1145_s5, %s783_s12  ;;  %s787_s18 = sshll.u32 %s913_s30, 4  ;;  %s788_s18 = int_to_ptr.vmem [resolvable:$false] %s787_s18 }
 0x14c   : > { %s789_s27 = scalar_lea.vmem %s788_s18, 256  ;;  %p790_p9 = scmp.lt.s32.totalorder %s1145_s5, %s788_s18 }
 0x14d   : > { %p785_p0 = pnand %p784_p11, %p1034_p10  ;;  %p791_p1 = scmp.lt.s32.totalorder %s789_s27, %s783_s12 }
 0x14f   : > { %p786_p5 = pneg %p785_p0  ;;  %p792_p2 = por %p791_p1, %p790_p9 }
 0x151   : > { %p793_p7 = pnand %p792_p2, %p786_p5 }
 0x1aa   : > { %v350_v11 = vpop.permute.xlu0 %349 }
 0x1ab   : > { %352 = vst.msk [vmem:[%s259_s9] sm:$0xff] %vm346_vm2, %v350_v11 }
 0x1ac   : > { %796 = shalt.err (!%p793_p7)
}
 0x1ad   : > { %s797_s13 = scalar_lea.hbm %s1143_s25, 128  ;;  %s801_s28 = scalar_lea.hbm %s1239_s3, 256 }
 0x1ae   : > { %p798_p3 = scmp.ne.s32.totalorder %s1143_s25, %s797_s13  ;;  %p802_p6 = scmp.lt.u32.totalorder %s1143_s25, %s1239_s3 }
 0x1af   : > { %p803_p8 = scmp.lt.u32.totalorder %s801_s28, %s797_s13  ;;  %p805_p11 = scmp.lt.u32.totalorder %s797_s13, %s1143_s25 }
 0x1b0   : > { %p799_p13 = pnand %p798_p3, %p1034_p10 }
 0x1b1   : > { %p804_p12 = por %p803_p8, %p802_p6 }
 0x1b2   : > { %p800_p4 = pneg %p799_p13 }
 0x1b3   : > { %p806_p0 = por %p805_p11, %p804_p12 }
 0x1b5   : > { %p807_p5 = pnand %p806_p0, %p800_p4 }
 0x1b7   : > { %810 = shalt.err (!%p807_p5)
}
 0x1b8   : > { %614 = dma.vmem_to_hbm [thread:$0]  (%p1034_p10), %s1145_s5, 128, %s1143_s25, %s1153_s21  }
 0x1b9   : > { %s1181_s27 = scalar_lea.hbm %s1240_s4, %s1103_s23  ;;  %v354_v12 = vpop.permute.xlu0 %353  ;;  %s811_s13 = scalar_lea.vmem %s1184_s26, 128 }
 0x1ba   : > { %356 = vst.msk [vmem:[%s266_s14] sm:$0xff] %vm346_vm2, %v354_v12  ;;  %p812_p9 = scmp.ne.s32.totalorder %s1184_s26, %s811_s13  ;;  %s914_s5 = smov [#allocation10]  }
 0x1bb   : > { %s815_s25 = sshll.u32 %s914_s5, 4  ;;  %s816_s25 = int_to_ptr.vmem [resolvable:$false] %s815_s25 }
 0x1bc   : > { %p813_p1 = pnand %p812_p9, %p1034_p10  ;;  %s817_s7 = scalar_lea.vmem %s816_s25, 256 }
 0x1bd   : > { %p818_p7 = scmp.lt.s32.totalorder %s1184_s26, %s816_s25  ;;  %p819_p3 = scmp.lt.s32.totalorder %s817_s7, %s811_s13 }
 0x1be   : > { %p814_p2 = pneg %p813_p1 }
 0x1bf   : > { %p820_p13 = por %p819_p3, %p818_p7 }
 0x1c1   : > { %p821_p4 = pnand %p820_p13, %p814_p2 }
 0x1c3   : > { %824 = shalt.err (!%p821_p4)
}
 0x1c4   : > { %s825_s10 = scalar_lea.hbm %s1181_s27, 128  ;;  %s829_s9 = scalar_lea.hbm %s1240_s4, 256 }
 0x1c5   : > { %p826_p6 = scmp.ne.s32.totalorder %s1181_s27, %s825_s10  ;;  %p830_p11 = scmp.lt.u32.totalorder %s1181_s27, %s1240_s4 }
 0x1c6   : > { %p831_p0 = scmp.lt.u32.totalorder %s829_s9, %s825_s10  ;;  %p833_p9 = scmp.lt.u32.totalorder %s825_s10, %s1181_s27 }
 0x1c7   : > { %p827_p8 = pnand %p826_p6, %p1034_p10 }
 0x1c8   : > { %p832_p5 = por %p831_p0, %p830_p11 }
 0x1c9   : > { %p828_p12 = pneg %p827_p8 }
 0x1ca   : > { %p834_p1 = por %p833_p9, %p832_p5 }
 0x1cc   : > { %p835_p2 = pnand %p834_p1, %p828_p12 }
 0x1ce   : > { %838 = shalt.err (!%p835_p2)
}
 0x1cf   : > { %615 = dma.vmem_to_hbm [thread:$0]  (%p1034_p10), %s1184_s26, 128, %s1181_s27, %s1153_s21  }
 0x1d0 PF: > { %s422_s30 = sand.u32 1, %s881_s15   ;;  %p1256_p7 = scmp.ne.s32.totalorder %s1245_s24, 0 }
 0x1d1   : > { %p1257_p3 = scmp.ge.s32.totalorder %s901_s20, 2  ;;  %s423_s12 = scalar_lea.sflag [#allocation4], %s422_s30 }
 0x1d3   : > { %p628_p13 = pnand %p1257_p3, %p1256_p7 }
 0x1d5   : > { %872 = dma.done.wait (!%p628_p13), %s423_s12, 128  }
 0x1d6   : > { %874 = vsyncadd (!%p628_p13), %s423_s12, 4294967168  ;;  %s431_s18 = sand.u32 1, %s564_s22  }
 0x1d7   : > { %s432_s13 = scalar_lea.sflag [#allocation9], %s431_s18 }
 0x1d8   : > { %876 = dma.done.wait (!%p628_p13), %s432_s13, 256  }
 0x1d9   : > { %878 = vsyncadd (!%p628_p13), %s432_s13, 4294967040  ;;  %s25_s20 = sadd.s32 1, %s901_s20   ;;  %s1258_s15 = smov %s885_s16 }
 0x1da   : > { %p22_p10 = scmp.ge.s32.totalorder %s25_s20, 4   ;;  %s1259_s16 = smov %s889_s17 }
 0x1db   : > { %s1260_s17 = smov %s1043_s8  ;;  %s1261_s18 = smov %s897_s19 }
 0x1dc   : > { %s1262_s19 = smov %s1264_s29  ;;  %24 = sbr.rel (!%p22_p10) target bundleno = 9 (0x9), region = 109 }
 0x1e3   :  { %446 = vsyncpa [#allocation3], 1 }
 0x1e4   :  { %448 = vsyncpa [#allocation3 + $0x1], 1 }
 0x1e5   :  { %449 = vsyncpa [#allocation6], 1 }
 0x1e6   :  { %450 = vsyncpa [#allocation4], 1 }
 0x1e7   :  { %452 = vsyncpa [#allocation4 + $0x1], 1 }
 0x1e8   :  { %453 = vsyncpa [#allocation9], 1 }
 0x1e9   :  { %455 = vsyncpa [#allocation9 + $0x1], 1 }

</bundles_post_ra>
